<compile_context>
chip_gen: v6e
topology: v6e:2x2x1
jax: 0.10.0
libtpu: 0.0.40
codegen_flags: <defaults>
</compile_context>

<pallas_src>
import math
import jax
import jax.numpy as jnp
from jax.experimental import pallas as pl
from jax.experimental.pallas import tpu as pltpu


# ---------------------------------------------------------------------------
# Kernels
# ---------------------------------------------------------------------------
def _linear_kernel_single_k(x_ref, w_ref, b_ref, o_ref):
    # x_ref: (tm, K), w_ref: (K, tn) [pre-transposed], b_ref: (1, tn)
    acc = jnp.dot(x_ref[...], w_ref[...], preferred_element_type=jnp.float32)
    o_ref[...] = (acc + b_ref[...].astype(jnp.float32)).astype(o_ref.dtype)


def _linear_kernel_multi_k_f32out(x_ref, w_ref, b_ref, o_ref):
    # f32 output: the output block is resident across the k axis -> accumulate
    # directly into o_ref (no scratch, no extra VMEM->VMEM copy).
    k = pl.program_id(2)

    @pl.when(k == 0)
    def _():
        o_ref[...] = jnp.broadcast_to(b_ref[...], o_ref.shape).astype(o_ref.dtype)

    o_ref[...] += jnp.dot(x_ref[...], w_ref[...], preferred_element_type=jnp.float32)


def _linear_kernel_multi_k_acc(x_ref, w_ref, b_ref, o_ref, acc_ref):
    # Narrow output dtype: keep a f32 accumulator scratch, downcast once.
    k = pl.program_id(2)

    @pl.when(k == 0)
    def _():
        acc_ref[...] = jnp.broadcast_to(b_ref[...], acc_ref.shape).astype(jnp.float32)

    acc_ref[...] += jnp.dot(x_ref[...], w_ref[...], preferred_element_type=jnp.float32)

    @pl.when(k == pl.num_programs(2) - 1)
    def _():
        o_ref[...] = acc_ref[...].astype(o_ref.dtype)


# ---------------------------------------------------------------------------
# Hardware / tile-selection helpers
# ---------------------------------------------------------------------------
def _vmem_capacity_bytes():
    """Per-TensorCore VMEM capacity; conservative 64 MiB fallback (v7x)."""
    try:
        info = pltpu.get_tpu_info()
        cap = getattr(info, "vmem_capacity_bytes", None)
        if cap:
            return max(int(cap), 32 << 20)
    except Exception:
        pass
    return 64 << 20


def _tile_options(dim, align, cap):
    """Tile sizes t with dim % t == 0, t % align == 0 (or t == dim), t <= cap.
    Descending. Falls back to the full extent if nothing aligned fits the cap
    (block_shape equal to the full array dim is always legal)."""
    opts = set()
    if dim <= cap:
        opts.add(dim)
    t = align
    top = min(dim - 1, cap)
    while t <= top:
        if dim % t == 0:
            opts.add(t)
        t += align
    if not opts:
        opts.add(dim)
    return sorted(opts, reverse=True)


def _select_tiles(B, N, K, caps, m_align, x_isz, w_isz, b_isz, o_isz, use_acc, budget):
    """Pick the largest (tm, tn, tk) whose double-buffered working set fits the
    per-core VMEM budget. Returns (tm, tn, tk, bytes_needed) or None."""
    m_opts = _tile_options(B, m_align, caps[0])
    n_opts = _tile_options(N, 128, caps[1])
    k_opts = _tile_options(K, 128, caps[2])

    def need(tm, tn, tk):
        multi_k = tk != K
        acc = tm * tn * 4 if (multi_k and use_acc) else 0
        x_t = tm * tk * x_isz
        w_t = tk * tn * w_isz
        b_t = 8 * tn * b_isz          # bias tile padded to >= 8 sublanes
        o_t = tm * tn * o_isz
        return 2 * (x_t + w_t + b_t + o_t) + acc

    # Preference order: largest tm (less whole-weight re-streaming), then
    # largest tn (lane-dense output, less x re-streaming), then largest tk.
    for tm in m_opts:
        for tn in n_opts:
            for tk in k_opts:
                nb = need(tm, tn, tk)
                if nb <= budget:
                    return tm, tn, tk, nb
    return None


# ---------------------------------------------------------------------------
# Wrapper
# ---------------------------------------------------------------------------
def softmax_head_forward(x, weight_t, bias, *, tm_cap=512, tn_cap=2048, tk_cap=2048,
                         fallback_mflop=2.0, weight_buffers=None):
    """out = x @ weight_t + bias.

    `weight_t` is the (in_features, out_features) = (K, N) pre-transposed
    weight (use `prepare_weight` once at parameter-setup time); `bias` is (N,).
    """
    B, K = x.shape
    K2, N = weight_t.shape
    assert K == K2, "weight in_features must match x"
    out_dtype = x.dtype

    # Tiny-problem fallback: a 1x1-grid pallas_call is pure launch/DMA-setup
    # overhead vs. a fused XLA dot.
    if 2.0 * B * N * K < fallback_mflop * 1e6:
        acc = jnp.dot(x, weight_t, preferred_element_type=jnp.float32)
        return (acc + bias.astype(jnp.float32)).astype(out_dtype)

    bias2d = bias.reshape(1, N)

    x_isz = jnp.dtype(x.dtype).itemsize
    w_isz = jnp.dtype(weight_t.dtype).itemsize
    b_isz = jnp.dtype(bias.dtype).itemsize
    o_isz = jnp.dtype(out_dtype).itemsize

    # Sublane alignment for the batch tile is packing-aware: 8/f32, 16/bf16, 32/i8.
    m_align = 8 * max(1, 4 // x_isz)

    vmem_cap = _vmem_capacity_bytes()          # per-TensorCore
    budget = int(vmem_cap * 0.70)              # leave room for compiler scratch

    use_acc = out_dtype != jnp.float32
    sel = _select_tiles(B, N, K, (tm_cap, tn_cap, tk_cap), m_align,
                        x_isz, w_isz, b_isz, o_isz, use_acc, budget)
    if sel is None:
        # No aligned tiling fits the per-core VMEM budget (pathological shapes)
        # -> let XLA handle it rather than risk a compile failure.
        acc = jnp.dot(x, weight_t, preferred_element_type=jnp.float32)
        return (acc + bias.astype(jnp.float32)).astype(out_dtype)

    tm, tn, tk, need = sel

    # Keep >= 2 parallel grid steps when possible so v7x megacore sharding has
    # work for both TensorCores (near-neutral on single-TC v5e/v6e).
    if (B // tm) * (N // tn) == 1 and tn % 256 == 0 and N % (tn // 2) == 0:
        tn //= 2

    vmem_limit = int(min(max(need * 3 // 2 + (4 << 20), 32 << 20),
                         int(vmem_cap * 0.9)))

    multi_k = tk != K

    def _w_spec(index_map):
        kwargs = {}
        if weight_buffers is not None and weight_buffers != 2:
            # Optional deeper buffering of the weight stream when xprof shows
            # exposed DMA in the small-B (memory-bound) regime.
            kwargs["pipeline_mode"] = pl.Buffered(weight_buffers)
        return pl.BlockSpec((tk, tn), index_map, **kwargs)

    if not multi_k:
        grid = (B // tm, N // tn)
        return pl.pallas_call(
            _linear_kernel_single_k,
            out_shape=jax.ShapeDtypeStruct((B, N), out_dtype),
            grid_spec=pltpu.PrefetchScalarGridSpec(
                num_scalar_prefetch=0,
                grid=grid,
                in_specs=[
                    pl.BlockSpec((tm, tk), lambda i, j: (i, 0)),   # x tile
                    _w_spec(lambda i, j: (0, j)),                  # (K, tn) weight tile
                    pl.BlockSpec((1, tn), lambda i, j: (0, j)),    # bias tile
                ],
                out_specs=pl.BlockSpec((tm, tn), lambda i, j: (i, j)),
            ),
            compiler_params=pltpu.CompilerParams(
                dimension_semantics=("parallel", "parallel"),
                vmem_limit_bytes=vmem_limit,
            ),
        )(x, weight_t, bias2d)

    # K split across a trailing reduction axis.
    grid = (B // tm, N // tn, K // tk)
    in_specs = [
        pl.BlockSpec((tm, tk), lambda i, j, k: (i, k)),            # x tile
        _w_spec(lambda i, j, k: (k, j)),                           # (tk, tn) weight tile
        pl.BlockSpec((1, tn), lambda i, j, k: (0, j)),             # bias tile
    ]
    out_spec = pl.BlockSpec((tm, tn), lambda i, j, k: (i, j))

    if use_acc:
        kernel = _linear_kernel_multi_k_acc
        scratch = [pltpu.VMEM((tm, tn), jnp.float32)]
    else:
        kernel = _linear_kernel_multi_k_f32out
        scratch = []

    return pl.pallas_call(
        kernel,
        out_shape=jax.ShapeDtypeStruct((B, N), out_dtype),
        grid_spec=pltpu.PrefetchScalarGridSpec(
            num_scalar_prefetch=0,
            grid=grid,
            in_specs=in_specs,
            out_specs=out_spec,
            scratch_shapes=scratch,
        ),
        compiler_params=pltpu.CompilerParams(
            dimension_semantics=("parallel", "parallel", "arbitrary"),
            vmem_limit_bytes=vmem_limit,
        ),
    )(x, weight_t, bias2d)


# ---------------------------------------------------------------------------
# Parameter setup (matches nn.init.xavier_uniform_ / zeros_)
# ---------------------------------------------------------------------------
def init_params(key, in_features, out_features):
    bound = math.sqrt(6.0 / (in_features + out_features))
    weight = jax.random.uniform(
        key, (out_features, in_features), dtype=jnp.float32,
        minval=-bound, maxval=bound,
    )
    bias = jnp.zeros((out_features,), dtype=jnp.float32)
    return weight, bias


def prepare_weight(weight_nk, dtype=None):
    """One-time transpose of the PyTorch-layout (N, K) weight to (K, N).
    Optionally cast (e.g. jnp.bfloat16) to halve weight HBM traffic; the kernel
    still accumulates in f32."""
    w_t = jnp.asarray(weight_nk.T)
    if dtype is not None:
        w_t = w_t.astype(dtype)
    return w_t


if __name__ == "__main__":
    in_features = 128
    out_features = 256
    batch = 8

    key = jax.random.PRNGKey(0)
    kx, kw = jax.random.split(key)

    x = jax.random.normal(kx, (batch, in_features), dtype=jnp.float32)
    label = jnp.zeros((batch,), dtype=jnp.int32)   # unused in forward (parity only)
    weight, bias = init_params(kw, in_features, out_features)

    # One-time (K, N) transpose of the static parameter -> no per-call transpose.
    weight_t = jax.block_until_ready(prepare_weight(weight))

    # fallback_mflop=0.0 forces the Pallas path even at these demo shapes.
    out = softmax_head_forward(x, weight_t, bias, fallback_mflop=0.0)
    out = jax.block_until_ready(out)

    # Sanity check against plain-JAX reference (PyTorch forward semantics).
    ref = x @ weight.T + bias
    assert out.shape == (batch, out_features)
    assert jnp.allclose(out, ref, atol=1e-4, rtol=1e-4)

    print("KERNEL_OK")
</pallas_src>

<mosaic_0001>
module attributes {stable_mosaic.version = 11 : i64} {
  func.func @_linear_kernel_single_k(%arg0: i32, %arg1: i32, %arg2: memref<8x128xf32, #tpu.memory_space<vmem>>, %arg3: memref<128x128xf32, #tpu.memory_space<vmem>>, %arg4: memref<1x128xf32, #tpu.memory_space<vmem>>, %arg5: memref<8x128xf32, #tpu.memory_space<vmem>>) attributes {dimension_semantics = [#tpu.dimension_semantics<parallel>, #tpu.dimension_semantics<parallel>], iteration_bounds = array<i64: 1, 2>, scalar_prefetch = 0 : i64, scratch_operands = 0 : i64, tpu.core_type = #tpu.core_type<tc>, window_params = [{transform_indices = @transform_0, window_bounds = array<i64: 8, 128>}, {transform_indices = @transform_1, window_bounds = array<i64: 128, 128>}, {transform_indices = @transform_2, window_bounds = array<i64: 1, 128>}, {transform_indices = @transform_3, window_bounds = array<i64: 8, 128>}]} {
    %c0 = arith.constant 0 : index
    %c0_0 = arith.constant 0 : index
    %0 = vector.load %arg2[%c0, %c0_0] : memref<8x128xf32, #tpu.memory_space<vmem>>, vector<8x128xf32>
    %c0_1 = arith.constant 0 : index
    %c0_2 = arith.constant 0 : index
    %1 = vector.load %arg3[%c0_1, %c0_2] : memref<128x128xf32, #tpu.memory_space<vmem>>, vector<128x128xf32>
    %cst = arith.constant dense<0.000000e+00> : vector<8x128xf32>
    %2 = tpu.matmul %0, %1, %cst {dimension_numbers = #tpu.dot_dimension_numbers<[1], [0], [0], [1], [0, 0, 1, 1], [], []>} : vector<8x128xf32>, vector<128x128xf32>, vector<8x128xf32> -> vector<8x128xf32>
    %c0_3 = arith.constant 0 : index
    %c0_4 = arith.constant 0 : index
    %3 = vector.load %arg4[%c0_3, %c0_4] : memref<1x128xf32, #tpu.memory_space<vmem>>, vector<1x128xf32>
    %4 = vector.broadcast %3 : vector<1x128xf32> to vector<8x128xf32>
    %5 = arith.addf %2, %4 : vector<8x128xf32>
    %c0_5 = arith.constant 0 : index
    %c0_6 = arith.constant 0 : index
    %6 = vector.load %arg5[%c0_5, %c0_6] : memref<8x128xf32, #tpu.memory_space<vmem>>, vector<8x128xf32>
    tpu.vector_store %arg5[%c0_5, %c0_6], %5 {strides = array<i32>} : memref<8x128xf32, #tpu.memory_space<vmem>>, vector<8x128xf32>,
    return
  }
  func.func @transform_0(%arg0: i32, %arg1: i32) -> (i32, i32) {
    %c0_i32 = arith.constant 0 : i32
    %c0_i32_0 = arith.constant 0 : i32
    return %arg0, %c0_i32 : i32, i32
  }
  func.func @transform_1(%arg0: i32, %arg1: i32) -> (i32, i32) {
    %c0_i32 = arith.constant 0 : i32
    %c0_i32_0 = arith.constant 0 : i32
    return %c0_i32, %arg1 : i32, i32
  }
  func.func @transform_2(%arg0: i32, %arg1: i32) -> (i32, i32) {
    %c0_i32 = arith.constant 0 : i32
    %c0_i32_0 = arith.constant 0 : i32
    return %c0_i32, %arg1 : i32, i32
  }
  func.func @transform_3(%arg0: i32, %arg1: i32) -> (i32, i32) {
    %c0_i32 = arith.constant 0 : i32
    return %arg0, %arg1 : i32, i32
  }
}

</mosaic_0001>

<bundles_post_ra>
// kernel: tpu_custom_call.1
= control target key start
LH: loop header
LB: loop body
LE: loop exit
PB: predicated region body
PF: predicated region fallthrough
CT: control target
= control target key end

     0   :  { %s957_s0 = inlined_call_operand.hbm [shape: f32[8,128], index: 0, kind: input, shape index: {}]   ;;  %s958_s1 = inlined_call_operand.hbm [shape: f32[128,256], index: 1, kind: input, shape index: {}]   ;;  %s959_s2 = inlined_call_operand.vmem [shape: f32[1,256], index: 2, kind: input, shape index: {}]   ;;  %s960_s3 = inlined_call_operand.hbm [shape: f32[8,256], index: 3, kind: output, shape index: {}]  }
   0x1   :  { %963 = sst [smem:[#allocation11_spill]] %s957_s0 }
   0x2   :  { %8 = vsyncpa [#allocation3], 0 }
   0x3   :  { %9 = vsyncpa [#allocation6], 0 }
   0x4   :  { %11 = vsyncpa [#allocation6 + $0x1], 0 }
   0x5   :  { %12 = vsyncpa [#allocation4], 0 }
   0x6   :  { %14 = vsyncpa [#allocation4 + $0x1], 0  ;;  %s764_s12 = smov 0   ;;  %s766_s13 = smov 0  }
   0x7   :  { %s768_s14 = smov 0   ;;  %s770_s15 = smov 0  }
   0x8   :  { %s772_s16 = smov 0   ;;  %s774_s17 = smov 0  }
   0x9 LB: > { %s450_s18 = sadd.s32 4294967295, %s734_s17   ;;  %s451_s19 = sadd.s32 4294967294, %s734_s17   ;;  %s734_s17 = sphi %s774_s17, %s20_s17   ;;  %s730_s16 = sphi %s772_s16, %s981_s16   ;;  %s726_s15 = sphi %s770_s15, %s980_s15   ;;  %s722_s14 = sphi %s768_s14, %s979_s14   ;;  %s718_s13 = sphi %s766_s13, %s978_s13   ;;  %s714_s12 = sphi %s764_s12, %s977_s12  }
   0xa   : > { %s65_s20 = sadd.s32 1, %s722_s14  ;;  %p72_p0 = scmp.ne.s32.totalorder %s722_s14, %s718_s13 }
   0xb   : > { %p73_p1 = scmp.eq.s32.totalorder %s734_s17, 0  ;;  %p78_p2 = scmp.ne.s32.totalorder %s718_s13, %s714_s12 }
   0xc   : > { %p802_p3 = scmp.eq.s32.totalorder %s450_s18, 0  ;;  %p130_p4 = scmp.eq.s32.totalorder %s450_s18, 1 }
   0xd   : > { %p806_p5 = por %p73_p1, %p72_p0  ;;  %p136_p6 = scmp.eq.s32.totalorder %s451_s19, 1 }
   0xe   : > { %p812_p7 = por %p802_p3, %p78_p2  ;;  %p816_p8 = por %p130_p4, %p72_p0 }
   0xf   : > { %p820_p9 = por %p136_p6, %p78_p2  ;;  %p452_p10 = scmp.ge.s32.totalorder %s734_s17, 1 }
  0x10   : > { %s966_s23 = scalar_select %p812_p7, 1, 0 }
  0x11   : > { %s967_s24 = scalar_select %p816_p8, 1, 0 }
  0x12   : > { %s968_s25 = scalar_select %p820_p9, 1, 0 }
  0x13   : > { %p143_p11 = scmp.lt.s32.totalorder %s734_s17, 3  ;;  %s736_s27 = smov [#allocation2]  }
  0x14   : > { %s158_s28 = sshll.u32 %s736_s27, 4  ;;  %p539_p1 = scmp.lt.s32.totalorder %s734_s17, 2  ;;  %s159_s28 = int_to_ptr.vmem [resolvable:$true] %s158_s28 }
  0x15   : > { %p827_p13 = pnand %p452_p10, %p143_p11  ;;  %s29_s4 = sadd.s32 1, %s730_s16 }
  0x16   : > { %p836_p4 = pnand %p539_p1, %p806_p5  ;;  %p30_p6 = scmp.ge.s32.totalorder %s29_s4, 2 }
  0x17   : > { %p526_p0 = pneg %p827_p13  ;;  %s169_s5 = sand.u32 1, %s722_s14  }
  0x18   : > { %s607_s6 = scalar_lea.vmem %s159_s28, 128  ;;  %p615_p8 = scmp.lt.s32.totalorder %s159_s28, %s159_s28 }
  0x19   : > { %p842_p2 = pnand %p526_p0, %p802_p3  ;;  %p608_p11 = scmp.ne.s32.totalorder %s159_s28, %s607_s6 }
  0x1a   : > { %p616_p5 = scmp.lt.s32.totalorder %s607_s6, %s607_s6 }
  0x1b   : > { %p598_p10 = pneg %p842_p2 }
  0x1c   : > { %p617_p1 = por %p616_p5, %p615_p8 }
  0x1d   : > { %p610_p12 = pnand %p608_p11, %p598_p10 }
  0x1f   : > { %p611_p9 = pneg %p610_p12 }
  0x21   : > { %p618_p7 = pnand %p617_p1, %p611_p9 }
  0x23   : > { %621 = shalt.err (!%p618_p7)
}
  0x24   : > { %s972_s0 = sld [smem:[#allocation11_spill]]  ;;  %s983_s4 = smov (%p30_p6, %s29_s4), 0 }
  0x25   : > { %s455_s9 = sshll.u32 %s169_s5, 7  ;;  %s62_s10 = ssub.s32 %s730_s16, %s983_s4 }
  0x26   : > { %p63_p12 = scmp.eq.s32.totalorder %s62_s10, 0  ;;  %s456_s11 = sshll.u32 %s730_s16, 7 }
  0x27   : > { %s178_s22 = scalar_lea.hbm %s958_s1, %s456_s11  ;;  %s173_s27 = scalar_lea.vmem [#allocation5], %s455_s9 }
  0x28   : > { %s179_s30 = sshll.u32 %s173_s27, 4  ;;  %s170_s7 = scalar_lea.sflag [#allocation6], %s169_s5  ;;  %s180_s30 = int_to_ptr.vmem [resolvable:$true] %s179_s30 }
  0x29   : > { %s866_s6 = scalar_select %p63_p12, %s722_s14, %s65_s20  }
  0x2a   : > { %529 = dma.hbm_to_vmem [thread:$0]  (!%p842_p2), %s972_s0, 128, %s159_s28, [#allocation3]  }
  0x2b   : > { %p624_p7 = pneg %p836_p4  ;;  %s635_s28 = scalar_lea.vmem %s180_s30, 2048 }
  0x2c   : > { %p636_p8 = scmp.ne.s32.totalorder %s180_s30, %s635_s28  ;;  %s737_s8 = smov [#allocation5]  }
  0x2d   : > { %s640_s10 = sshll.u32 %s737_s8, 4  ;;  %s641_s10 = int_to_ptr.vmem [resolvable:$false] %s640_s10 }
  0x2e   : > { %p638_p9 = pnand %p636_p8, %p624_p7  ;;  %s642_s0 = scalar_lea.vmem %s641_s10, 4096 }
  0x2f   : > { %p643_p2 = scmp.lt.s32.totalorder %s180_s30, %s641_s10  ;;  %p644_p6 = scmp.lt.s32.totalorder %s642_s0, %s635_s28 }
  0x30   : > { %p639_p0 = pneg %p638_p9 }
  0x31   : > { %p645_p10 = por %p644_p6, %p643_p2 }
  0x33   : > { %p646_p11 = pnand %p645_p10, %p639_p0 }
  0x35   : > { %649 = shalt.err (!%p646_p11)
}
  0x36   : > { %s738_s9 = smov 256   ;;  %s739_s20 = smov 128  }
  0x37   : > { %s740_s11 = smov 8   ;;  %197 = sbr.rel (%p827_p13) target bundleno = 306 (0x132), region = 32 }
  0x38   : > { %533 = dma.hbm_to_vmem [thread:$0]  (!%p836_p4), %s178_s22, 2048, %s180_s30, %s170_s7, %s738_s9, %s739_s20, %s740_s11  }
  0x3c   : > { %701 = dma.done.wait (%p802_p3), [#allocation3], 128  }
  0x3d   : > { %703 = vsyncadd (%p802_p3), [#allocation3], 4294967168  ;;  %s879_s0 = sand.u32 1, %s718_s13   ;;  %p973_p4 = scmp.ne.s32.totalorder %s966_s23, 0 }
  0x3e   : > { %s459_s5 = sshll.u32 %s879_s0, 7  ;;  %s204_s18 = scalar_lea.sflag [#allocation6], %s879_s0 }
  0x3f   : > { %s883_s19 = scalar_lea.vmem [#allocation5], %s459_s5 }
  0x40   : > { %705 = dma.done.wait (%p973_p4), %s204_s18, 2048  }
  0x41   : > { %707 = vsyncadd (%p973_p4), %s204_s18, 4294965248  ;;  %v741_v0 = vmov 0.0   ;;  %vm742_vm0 = vmmov 0   ;;  %v252_v1 = vld [vmem:[%s883_s19 + $0x78] sm:$0xff]  ;;  %v251_v2 = vld [vmem:[%s883_s19 + $0x70] sm:$0xff]  ;;  %p233_p3 = scmp.lt.s32.totalorder %s726_s15, 1 }
  0x42   : > { %483 = vmatprep.subr.mxu0 %v741_v0  ;;  %515 = vmatprep.mubr.msk.f32.mxu0 %vm742_vm0, %v741_v0  ;;  %v250_v3 = vld [vmem:[%s883_s19 + $0x68] sm:$0xff]  ;;  %v249_v4 = vld [vmem:[%s883_s19 + $0x60] sm:$0xff]  ;;  %v248_v5 = vld [vmem:[%s883_s19 + $0x58] sm:$0xff]  ;;  %s460_s23 = sshll.u32 %s879_s0, 3  ;;  %s463_s27 = sshll.u32 %s726_s15, 7 }
  0x43   : > { %484 = vmatpush3.msra.mxu0 %v252_v1  ;;  %v247_v6 = vld [vmem:[%s883_s19 + $0x50] sm:$0xff]  ;;  %v246_v7 = vld [vmem:[%s883_s19 + $0x48] sm:$0xff]  ;;  %v245_v8 = vld [vmem:[%s883_s19 + $0x40] sm:$0xff]  ;;  %s234_s21 = scalar_select %p233_p3, %s726_s15, 1 }
  0x44   : > { %485 = vmatprep.subr.mxu0 %v741_v0  ;;  %v244_v9 = vld [vmem:[%s883_s19 + $0x38] sm:$0xff]  ;;  %v243_v10 = vld [vmem:[%s883_s19 + $0x30] sm:$0xff]  ;;  %v242_v11 = vld [vmem:[%s883_s19 + $0x28] sm:$0xff]  ;;  %s232_s30 = scalar_lea.vmem [#allocation7], %s460_s23  ;;  %s915_s10 = scalar_lea.hbm %s960_s3, %s463_s27 }
  0x45   : > { %486 = vmatpush3.msra.mxu0 %v251_v2  ;;  %v241_v12 = vld [vmem:[%s883_s19 + $0x20] sm:$0xff]  ;;  %v240_v13 = vld [vmem:[%s883_s19 + $0x18] sm:$0xff]  ;;  %v239_v14 = vld [vmem:[%s883_s19 + $0x10] sm:$0xff]  ;;  %s235_s22 = scalar_lea.vmem %s959_s2, %s234_s21  ;;  %s347_s7 = sshll.u32 %s232_s30, 4  ;;  %s348_s7 = int_to_ptr.vmem [resolvable:$true] %s347_s7 }
  0x46   : > { %487 = vmatprep.subr.mxu0 %v741_v0  ;;  %v238_v15 = vld [vmem:[%s883_s19 + $0x8] sm:$0xff]  ;;  %v237_v16 = vld [vmem:[%s883_s19] sm:$0xff]  ;;  %v236_v17 = vld [vmem:[#allocation2] sm:$0xff]  ;;  %s332_s9 = scalar_lea.sflag [#allocation4], %s879_s0  ;;  %s650_s20 = scalar_lea.vmem %s348_s7, 128 }
  0x47   : > { %488 = vmatpush3.msra.mxu0 %v250_v3  ;;  %v461_v18 = vld [vmem:[%s235_s22] ss:$0 sm:$0xff]  ;;  %p651_p13 = scmp.ne.s32.totalorder %s348_s7, %s650_s20  ;;  %p974_p5 = scmp.ne.s32.totalorder %s967_s24, 0 }
  0x48   : > { %489 = vmatprep.subr.mxu0 %v741_v0  ;;  %s743_s11 = smov [#allocation7]  }
  0x49   : > { %490 = vmatpush3.msra.mxu0 %v249_v4  ;;  %p652_p1 = pnand %p651_p13, %p974_p5  ;;  %s654_s15 = sshll.u32 %s743_s11, 4  ;;  %s655_s15 = int_to_ptr.vmem [resolvable:$false] %s654_s15 }
  0x4a   : > { %491 = vmatprep.subr.mxu0 %v741_v0  ;;  %s656_s5 = scalar_lea.vmem %s655_s15, 256  ;;  %p657_p7 = scmp.lt.s32.totalorder %s348_s7, %s655_s15 }
  0x4b   : > { %492 = vmatpush3.msra.mxu0 %v248_v5  ;;  %p653_p12 = pneg %p652_p1  ;;  %p658_p8 = scmp.lt.s32.totalorder %s656_s5, %s650_s20 }
  0x4c   : > { %493 = vmatprep.subr.mxu0 %v741_v0 }
  0x4d   : > { %494 = vmatpush3.msra.mxu0 %v247_v6  ;;  %p659_p9 = por %p658_p8, %p657_p7 }
  0x4e   : > { %495 = vmatprep.subr.mxu0 %v741_v0 }
  0x4f   : > { %496 = vmatpush3.msra.mxu0 %v246_v7  ;;  %p660_p0 = pnand %p659_p9, %p653_p12 }
  0x50   : > { %497 = vmatprep.subr.mxu0 %v741_v0 }
  0x51   : > { %498 = vmatpush3.msra.mxu0 %v245_v8 }
  0x52   : > { %499 = vmatprep.subr.mxu0 %v741_v0 }
  0x53   : > { %500 = vmatpush3.msra.mxu0 %v244_v9 }
  0x54   : > { %501 = vmatprep.subr.mxu0 %v741_v0 }
  0x55   : > { %502 = vmatpush3.msra.mxu0 %v243_v10 }
  0x56   : > { %503 = vmatprep.subr.mxu0 %v741_v0 }
  0x57   : > { %504 = vmatpush3.msra.mxu0 %v242_v11 }
  0x58   : > { %505 = vmatprep.subr.mxu0 %v741_v0 }
  0x59   : > { %506 = vmatpush3.msra.mxu0 %v241_v12 }
  0x5a   : > { %507 = vmatprep.subr.mxu0 %v741_v0 }
  0x5b   : > { %508 = vmatpush3.msra.mxu0 %v240_v13 }
  0x5c   : > { %509 = vmatprep.subr.mxu0 %v741_v0 }
  0x5d   : > { %510 = vmatpush3.msra.mxu0 %v239_v14 }
  0x5e   : > { %511 = vmatprep.subr.mxu0 %v741_v0 }
  0x5f   : > { %512 = vmatpush3.msra.mxu0 %v238_v15 }
  0x60   : > { %513 = vmatprep.subr.mxu0 %v741_v0 }
  0x61   : > { %514 = vmatpush3.msra.mxu0 %v237_v16 }
  0x62   : > { %516 = vmatmul.mubr.f32.vlgmr.msra.gmra.mxu0 %v236_v17 }
 0x122   : > { %v326_v19 = vpop.f32.mrf.mxu0 }
 0x123   : > { %v327_v20 = vadd.f32 %v461_v18, %v326_v19 }
 0x124   : > { %v517_v21 = vpop.f32.mrf.mxu0 }
 0x125   : > { %330 = vst [vmem:[%s232_s30] sm:$0xff] %v327_v20 }
 0x126   : > { %663 = shalt.err (!%p660_p0)
}
 0x127   : > { %s664_s18 = scalar_lea.hbm %s915_s10, 128  ;;  %s668_s21 = scalar_lea.hbm %s960_s3, 256 }
 0x128   : > { %p665_p2 = scmp.ne.s32.totalorder %s915_s10, %s664_s18  ;;  %p669_p11 = scmp.lt.s32.totalorder %s915_s10, %s960_s3 }
 0x129   : > { %p670_p4 = scmp.lt.s32.totalorder %s668_s21, %s664_s18 }
 0x12a   : > { %p666_p6 = pnand %p665_p2, %p974_p5 }
 0x12b   : > { %p671_p3 = por %p670_p4, %p669_p11 }
 0x12c   : > { %p667_p10 = pneg %p666_p6 }
 0x12e   : > { %p672_p13 = pnand %p671_p3, %p667_p10 }
 0x130   : > { %675 = shalt.err (!%p672_p13)
}
 0x131   : > { %524 = dma.vmem_to_hbm [thread:$0]  (%p974_p5), %s348_s7, 128, %s915_s10, %s332_s9  }
 0x132 PF: > { %s359_s29 = sand.u32 1, %s714_s12   ;;  %p975_p1 = scmp.ne.s32.totalorder %s968_s25, 0 }
 0x133   : > { %p976_p12 = scmp.ge.s32.totalorder %s734_s17, 2  ;;  %s360_s22 = scalar_lea.sflag [#allocation4], %s359_s29 }
 0x135   : > { %p535_p7 = pnand %p976_p12, %p975_p1 }
 0x137   : > { %p536_p8 = pneg %p535_p7 }
 0x139   : > { %709 = dma.done.wait (%p536_p8), %s360_s22, 128  }
 0x13a   : > { %711 = vsyncadd (%p536_p8), %s360_s22, 4294967168  ;;  %s20_s17 = sadd.s32 1, %s734_s17   ;;  %s977_s12 = smov %s718_s13 }
 0x13b   : > { %p17_p9 = scmp.ge.s32.totalorder %s20_s17, 4   ;;  %s978_s13 = smov %s722_s14 }
 0x13c   : > { %s979_s14 = smov %s866_s6  ;;  %s980_s15 = smov %s730_s16 }
 0x13d   : > { %s981_s16 = smov %s983_s4  ;;  %19 = sbr.rel (!%p17_p9) target bundleno = 9 (0x9), region = 86 }
 0x142   :  { %365 = vsyncpa [#allocation3], 1 }
 0x143   :  { %367 = vsyncpa [#allocation3 + $0x1], 1 }
 0x144   :  { %368 = vsyncpa [#allocation6], 1 }
 0x145   :  { %370 = vsyncpa [#allocation6 + $0x1], 1 }
 0x146   :  { %371 = vsyncpa [#allocation4], 1 }
 0x147   :  { %373 = vsyncpa [#allocation4 + $0x1], 1 }

</bundles_post_ra>
